<compile_context>
chip_gen: v6e
topology: v6e:2x2x1
jax: 0.10.0
libtpu: 0.0.40
codegen_flags: <defaults>
</compile_context>

<pallas_src>
import jax
import jax.numpy as jnp
from jax import lax
from jax.experimental import pallas as pl
from jax.experimental.pallas import tpu as pltpu

BN_EPS = 1e-5


def relation_kernel(eh_ref, user_ref, w1t_eh_ref, w1t_user_ref, w2t_ref,
                    bias_ref, out_ref):
    hidden = w2t_ref.shape[0]          # 256 (static)
    b1 = bias_ref[:, :hidden]          # [1, 256]  (lane-aligned static slice)
    b2 = bias_ref[:, hidden:]          # [1, embed]

    # fc1 without concat: [bs,E]@[E,256] + [bs,E]@[E,256]  (MXU), + bias, relu (VPU)
    h = (jnp.dot(eh_ref[...], w1t_eh_ref[...], preferred_element_type=jnp.float32)
         + jnp.dot(user_ref[...], w1t_user_ref[...], preferred_element_type=jnp.float32)
         + b1)
    h = jnp.maximum(h, 0.0)
    # TODO(synk): dropout(p=0.4) is stochastic in train mode; eval mode -> identity.
    # BatchNorm (eval) is pre-folded into w2t_ref / b2 in the wrapper.

    # fc2: [bs,256]@[256,E] (MXU) + folded bias + residual eh_vec
    out = jnp.dot(h, w2t_ref[...], preferred_element_type=jnp.float32) + b2 + eh_ref[...]
    out_ref[...] = out.astype(out_ref.dtype)


def relation_module_forward(eh_vec, user_vec, params):
    """eh_vec, user_vec: [bs, embed] float32. Returns [bs, embed] float32."""
    bs, embed = eh_vec.shape
    hidden = params["b1"].shape[-1]

    # --- wrapper-side algebra (all cheap, O(hidden*embed)) ------------------
    # Fold eval-mode BatchNorm into fc2.
    scale = params["bn_gamma"] * lax.rsqrt(params["bn_var"] + BN_EPS)      # [256]
    shift = params["bn_beta"] - params["bn_mean"] * scale                  # [256]
    w2t = params["w2"].T                                                   # [256, E]
    w2t_folded = scale[:, None] * w2t                                      # [256, E]
    b2_folded = params["b2"] + shift @ w2t                                 # [E]

    # Split W1 so the kernel never needs the concatenated [eh, user] input.
    w1t_eh = params["w1"][:, :embed].T                                     # [E, 256]
    w1t_user = params["w1"][:, embed:].T                                   # [E, 256]

    # Pack the two bias vectors into a single [1, hidden+embed] DMA.
    bias_pack = jnp.concatenate([params["b1"], b2_folded]).reshape(1, hidden + embed)

    vmem = pl.BlockSpec(memory_space=pltpu.MemorySpace.VMEM)
    return pl.pallas_call(
        relation_kernel,
        out_shape=jax.ShapeDtypeStruct((bs, embed), jnp.float32),
        in_specs=[vmem] * 6,
        out_specs=vmem,
    )(eh_vec, user_vec, w1t_eh, w1t_user, w2t_folded, bias_pack)


def init_params(key, embed_size, hidden=256):
    """Deterministic synthetic parameters matching nn.Linear / nn.BatchNorm1d shapes."""
    k1, k2, k3, k4, k5, k6 = jax.random.split(key, 6)
    in1 = embed_size * 2
    lim1 = 1.0 / jnp.sqrt(in1)
    lim2 = 1.0 / jnp.sqrt(hidden)
    return {
        "w1": jax.random.uniform(k1, (hidden, in1), jnp.float32, -lim1, lim1),
        "b1": jax.random.uniform(k2, (hidden,), jnp.float32, -lim1, lim1),
        "w2": jax.random.uniform(k3, (embed_size, hidden), jnp.float32, -lim2, lim2),
        "b2": jax.random.uniform(k4, (embed_size,), jnp.float32, -lim2, lim2),
        # Non-trivial BN running stats / affine params to exercise the folding.
        "bn_gamma": 1.0 + 0.1 * jax.random.normal(k5, (hidden,), jnp.float32),
        "bn_beta": 0.1 * jax.random.normal(k6, (hidden,), jnp.float32),
        "bn_mean": 0.05 * jnp.ones((hidden,), jnp.float32),
        "bn_var": jnp.ones((hidden,), jnp.float32),
    }


def reference_forward(eh_vec, user_vec, params):
    """Pure-JAX reference matching the PyTorch module in eval mode."""
    x = jnp.concatenate([eh_vec, user_vec], axis=-1)
    h = jnp.maximum(x @ params["w1"].T + params["b1"], 0.0)
    h = (h - params["bn_mean"]) / jnp.sqrt(params["bn_var"] + BN_EPS)
    h = h * params["bn_gamma"] + params["bn_beta"]
    return h @ params["w2"].T + params["b2"] + eh_vec


if __name__ == "__main__":
    bs, embed_size = 8, 32
    key = jax.random.PRNGKey(0)
    kp, ke, ku = jax.random.split(key, 3)
    params = init_params(kp, embed_size)
    eh_vec = jax.random.normal(ke, (bs, embed_size), jnp.float32)
    user_vec = jax.random.normal(ku, (bs, embed_size), jnp.float32)

    out = relation_module_forward(eh_vec, user_vec, params)
    out = jax.block_until_ready(out)

    ref = reference_forward(eh_vec, user_vec, params)
    assert out.shape == (bs, embed_size)
    # BN folding differs from the unfolded reference only by fp reassociation.
    assert jnp.allclose(out, ref, atol=1e-4, rtol=1e-4), "mismatch vs reference"
    print("KERNEL_OK")
</pallas_src>

<mosaic_0001>
module attributes {stable_mosaic.version = 11 : i64} {
  func.func @relation_kernel(%arg0: memref<8x32xf32, #tpu.memory_space<vmem>>, %arg1: memref<8x32xf32, #tpu.memory_space<vmem>>, %arg2: memref<32x256xf32, #tpu.memory_space<vmem>>, %arg3: memref<32x256xf32, #tpu.memory_space<vmem>>, %arg4: memref<256x32xf32, #tpu.memory_space<vmem>>, %arg5: memref<1x288xf32, #tpu.memory_space<vmem>>, %arg6: memref<8x32xf32, #tpu.memory_space<vmem>>) attributes {dimension_semantics = [], scalar_prefetch = 0 : i64, scratch_operands = 0 : i64, tpu.core_type = #tpu.core_type<tc>} {
    %c0 = arith.constant 0 : index
    %c0_0 = arith.constant 0 : index
    %0 = vector.load %arg5[%c0, %c0_0] : memref<1x288xf32, #tpu.memory_space<vmem>>, vector<1x256xf32>
    %c0_1 = arith.constant 0 : index
    %c256 = arith.constant 256 : index
    %1 = vector.load %arg5[%c0_1, %c256] : memref<1x288xf32, #tpu.memory_space<vmem>>, vector<1x32xf32>
    %c0_2 = arith.constant 0 : index
    %c0_3 = arith.constant 0 : index
    %2 = vector.load %arg0[%c0_2, %c0_3] : memref<8x32xf32, #tpu.memory_space<vmem>>, vector<8x32xf32>
    %c0_4 = arith.constant 0 : index
    %c0_5 = arith.constant 0 : index
    %3 = vector.load %arg2[%c0_4, %c0_5] : memref<32x256xf32, #tpu.memory_space<vmem>>, vector<32x256xf32>
    %cst = arith.constant dense<0.000000e+00> : vector<8x256xf32>
    %4 = tpu.matmul %2, %3, %cst {dimension_numbers = #tpu.dot_dimension_numbers<[1], [0], [0], [1], [0, 0, 1, 1], [], []>} : vector<8x32xf32>, vector<32x256xf32>, vector<8x256xf32> -> vector<8x256xf32>
    %c0_6 = arith.constant 0 : index
    %c0_7 = arith.constant 0 : index
    %5 = vector.load %arg1[%c0_6, %c0_7] : memref<8x32xf32, #tpu.memory_space<vmem>>, vector<8x32xf32>
    %c0_8 = arith.constant 0 : index
    %c0_9 = arith.constant 0 : index
    %6 = vector.load %arg3[%c0_8, %c0_9] : memref<32x256xf32, #tpu.memory_space<vmem>>, vector<32x256xf32>
    %cst_10 = arith.constant dense<0.000000e+00> : vector<8x256xf32>
    %7 = tpu.matmul %5, %6, %cst_10 {dimension_numbers = #tpu.dot_dimension_numbers<[1], [0], [0], [1], [0, 0, 1, 1], [], []>} : vector<8x32xf32>, vector<32x256xf32>, vector<8x256xf32> -> vector<8x256xf32>
    %8 = arith.addf %4, %7 : vector<8x256xf32>
    %9 = vector.broadcast %0 : vector<1x256xf32> to vector<8x256xf32>
    %10 = arith.addf %8, %9 : vector<8x256xf32>
    %cst_11 = arith.constant 0.000000e+00 : f32
    %11 = vector.broadcast %cst_11 : f32 to vector<8x256xf32>
    %12 = arith.maximumf %10, %11 : vector<8x256xf32>
    %c0_12 = arith.constant 0 : index
    %c0_13 = arith.constant 0 : index
    %13 = vector.load %arg4[%c0_12, %c0_13] : memref<256x32xf32, #tpu.memory_space<vmem>>, vector<256x32xf32>
    %cst_14 = arith.constant dense<0.000000e+00> : vector<8x32xf32>
    %14 = tpu.matmul %12, %13, %cst_14 {dimension_numbers = #tpu.dot_dimension_numbers<[1], [0], [0], [1], [0, 0, 1, 1], [], []>} : vector<8x256xf32>, vector<256x32xf32>, vector<8x32xf32> -> vector<8x32xf32>
    %15 = vector.broadcast %1 : vector<1x32xf32> to vector<8x32xf32>
    %16 = arith.addf %14, %15 : vector<8x32xf32>
    %c0_15 = arith.constant 0 : index
    %c0_16 = arith.constant 0 : index
    %17 = vector.load %arg0[%c0_15, %c0_16] : memref<8x32xf32, #tpu.memory_space<vmem>>, vector<8x32xf32>
    %18 = arith.addf %16, %17 : vector<8x32xf32>
    %c0_17 = arith.constant 0 : index
    %c0_18 = arith.constant 0 : index
    %19 = vector.load %arg6[%c0_17, %c0_18] : memref<8x32xf32, #tpu.memory_space<vmem>>, vector<8x32xf32>
    tpu.vector_store %arg6[%c0_17, %c0_18], %18 {strides = array<i32>} : memref<8x32xf32, #tpu.memory_space<vmem>>, vector<8x32xf32>,
    return
  }
}

</mosaic_0001>

<bundles_post_ra>
// kernel: tpu_custom_call.1
= control target key start
LH: loop header
LB: loop body
LE: loop exit
PB: predicated region body
PF: predicated region fallthrough
CT: control target
= control target key end

     0   :  { %v394_v4 = vmov 0.0   ;;  %vm44_vm0 = vcmask 261120   ;;  %s597_s0 = inlined_call_operand.vmem [shape: f32[8,32], index: 0, kind: input, shape index: {}]   ;;  %s598_s1 = inlined_call_operand.vmem [shape: f32[8,32], index: 1, kind: input, shape index: {}]   ;;  %s599_s2 = inlined_call_operand.vmem [shape: f32[32,256], index: 2, kind: input, shape index: {}]   ;;  %s600_s3 = inlined_call_operand.vmem [shape: f32[32,256], index: 3, kind: input, shape index: {}]   ;;  %s601_s4 = inlined_call_operand.vmem [shape: f32[256,32], index: 4, kind: input, shape index: {}]   ;;  %s602_s5 = inlined_call_operand.vmem [shape: f32[1,288], index: 5, kind: input, shape index: {}]   ;;  %s603_s6 = inlined_call_operand.hbm [shape: f32[8,32], index: 6, kind: output, shape index: {}]  }
   0x1   :  { %v43_v0 = vld [vmem:[%s600_s3 + $0x38] sm:$0xff]  ;;  %v42_v1 = vld [vmem:[%s600_s3 + $0x30] sm:$0xff]  ;;  %v41_v2 = vld [vmem:[%s600_s3 + $0x28] sm:$0xff]  ;;  %112 = vmatprep.mubr.f32.mxu1 %v394_v4 }
   0x2   :  { %72 = vmatprep.subr.mxu1 %v43_v0  ;;  %v40_v3 = vld [vmem:[%s600_s3 + $0x20] sm:$0xff]  ;;  %v39_v5 = vld [vmem:[%s600_s3 + $0x18] sm:$0xff]  ;;  %v38_v6 = vld [vmem:[%s600_s3 + $0x10] sm:$0xff] }
   0x3   :  { %73 = vmatpush1.msra.mxu1 %v42_v1  ;;  %v37_v7 = vld [vmem:[%s600_s3 + $0x8] sm:$0xff]  ;;  %v36_v8 = vld [vmem:[%s600_s3] sm:$0xff]  ;;  %v34_v10 = vld [vmem:[%s599_s2 + $0x38] sm:$0xff] }
   0x4   :  { %74 = vmatprep.subr.mxu1 %v41_v2  ;;  %v35_v9 = vld [vmem:[%s598_s1] sm:$0xff]  ;;  %v239_v11 = vld [vmem:[%s601_s4 + $0xf8] sm:$0xff]  ;;  %v33_v13 = vld [vmem:[%s599_s2 + $0x30] sm:$0xff] }
   0x5   :  { %75 = vmatpush1.msra.mxu1 %v40_v3  ;;  %v223_v12 = vld [vmem:[%s601_s4 + $0x78] sm:$0xff]  ;;  %335 = vmatprep.subr.mxu0 %v239_v11  ;;  %v32_v14 = vld [vmem:[%s599_s2 + $0x28] sm:$0xff]  ;;  %v238_v15 = vld [vmem:[%s601_s4 + $0xf0] sm:$0xff] }
   0x6   :  { %76 = vmatprep.subr.mxu1 %v39_v5  ;;  %336 = vmatpush3.msra.mxu0 %v223_v12  ;;  %v31_v16 = vld [vmem:[%s599_s2 + $0x20] sm:$0xff]  ;;  %v222_v17 = vld [vmem:[%s601_s4 + $0x70] sm:$0xff]  ;;  %v30_v18 = vld [vmem:[%s599_s2 + $0x18] sm:$0xff] }
   0x7   :  { %77 = vmatpush1.msra.mxu1 %v38_v6  ;;  %v237_v19 = vld [vmem:[%s601_s4 + $0xe8] sm:$0xff] }
   0x8   :  { %78 = vmatprep.subr.mxu1 %v37_v7 }
   0x9   :  { %79 = vmatpush1.msra.mxu1 %v36_v8 }
   0xa   :  { %332 = vmatmul.mubr.msk.f32.vlgmr.msra.gmra.mxu1 %vm44_vm0, %v35_v9  ;;  %146 = vmatprep.subr.mxu1 %v34_v10 }
   0xb   :  { %147 = vmatpush1.msra.mxu1 %v33_v13  ;;  %186 = vmatprep.mubr.f32.mxu1 %v394_v4 }
   0xc   :  { %11 = vsyncpa [#allocation3], 0  ;;  %148 = vmatprep.subr.mxu1 %v32_v14  ;;  %v29_v20 = vld [vmem:[%s599_s2 + $0x10] sm:$0xff]  ;;  %337 = vmatprep.subr.mxu0 %v238_v15  ;;  %v221_v21 = vld [vmem:[%s601_s4 + $0x68] sm:$0xff]  ;;  %v194_v51 = vlaneseq  ;;  %s395_s18 = smov [#allocation2]  }
   0xd   :  { %149 = vmatpush1.msra.mxu1 %v31_v16  ;;  %v28_v22 = vld [vmem:[%s599_s2 + $0x8] sm:$0xff]  ;;  %338 = vmatpush3.msra.mxu0 %v222_v17  ;;  %v236_v23 = vld [vmem:[%s601_s4 + $0xe0] sm:$0xff]  ;;  %v235_v27 = vld [vmem:[%s601_s4 + $0xd8] sm:$0xff]  ;;  %s324_s19 = sshll.u32 %s395_s18, 4  ;;  %s325_s19 = int_to_ptr.vmem [resolvable:$true] %s324_s19 }
   0xe   :  { %150 = vmatprep.subr.mxu1 %v30_v18  ;;  %v27_v24 = vld [vmem:[%s599_s2] sm:$0xff]  ;;  %339 = vmatprep.subr.mxu0 %v237_v19  ;;  %v219_v28 = vld [vmem:[%s601_s4 + $0x58] sm:$0xff]  ;;  %v234_v29 = vld [vmem:[%s601_s4 + $0xd0] sm:$0xff]  ;;  %v195_v52 = vshrl.u32 %v194_v51, 7  ;;  %s372_s20 = scalar_lea.vmem %s325_s19, 128  ;;  %p377_p1 = scmp.lt.s32.totalorder %s325_s19, %s325_s19 }
   0xf   :  { %v220_v25 = vld [vmem:[%s601_s4 + $0x60] sm:$0xff]  ;;  %151 = vmatpush1.msra.mxu1 %v29_v20  ;;  %340 = vmatpush3.msra.mxu0 %v221_v21  ;;  %v218_v30 = vld [vmem:[%s601_s4 + $0x50] sm:$0xff]  ;;  %v233_v31 = vld [vmem:[%s601_s4 + $0xc8] sm:$0xff]  ;;  %p373_p0 = scmp.ne.s32.totalorder %s325_s19, %s372_s20  ;;  %p378_p2 = scmp.lt.s32.totalorder %s372_s20, %s372_s20 }
  0x10   :  { %v510_v26 = vld [vmem:[%s597_s0] sm:$0xff]  ;;  %152 = vmatprep.subr.mxu1 %v28_v22  ;;  %341 = vmatprep.subr.mxu0 %v236_v23  ;;  %v217_v32 = vld [vmem:[%s601_s4 + $0x48] sm:$0xff]  ;;  %v231_v35 = vld [vmem:[%s601_s4 + $0xb8] sm:$0xff]  ;;  %v196_v54 = vsub.s32 0, %v195_v52  ;;  %v200_v56 = vsub.s32 1, %v195_v52 }
  0x11   :  { %153 = vmatpush1.msra.mxu1 %v27_v24  ;;  %342 = vmatpush3.msra.mxu0 %v220_v25  ;;  %v232_v33 = vld [vmem:[%s601_s4 + $0xc0] sm:$0xff]  ;;  %v215_v36 = vld [vmem:[%s601_s4 + $0x38] sm:$0xff]  ;;  %v230_v37 = vld [vmem:[%s601_s4 + $0xb0] sm:$0xff]  ;;  %p379_p3 = por %p378_p2, %p377_p1 }
  0x12   :  { %333 = vmatmul.mubr.msk.f32.vlgmr.msra.gmra.mxu1 %vm44_vm0, %v510_v26  ;;  %343 = vmatprep.subr.mxu0 %v235_v27  ;;  %v216_v34 = vld [vmem:[%s601_s4 + $0x40] sm:$0xff]  ;;  %v214_v38 = vld [vmem:[%s601_s4 + $0x30] sm:$0xff]  ;;  %v229_v39 = vld [vmem:[%s601_s4 + $0xa8] sm:$0xff] }
  0x13   :  { %344 = vmatpush3.msra.mxu0 %v219_v28  ;;  %v213_v40 = vld [vmem:[%s601_s4 + $0x28] sm:$0xff]  ;;  %v228_v41 = vld [vmem:[%s601_s4 + $0xa0] sm:$0xff]  ;;  %v227_v43 = vld [vmem:[%s601_s4 + $0x98] sm:$0xff]  ;;  %p380_p4 = pnand %p379_p3, %p373_p0 }
  0x14   :  { %345 = vmatprep.subr.mxu0 %v234_v29  ;;  %v212_v42 = vld [vmem:[%s601_s4 + $0x20] sm:$0xff]  ;;  %v211_v44 = vld [vmem:[%s601_s4 + $0x18] sm:$0xff]  ;;  %v226_v45 = vld [vmem:[%s601_s4 + $0x90] sm:$0xff] }
  0x15   :  { %346 = vmatpush3.msra.mxu0 %v218_v30  ;;  %v210_v46 = vld [vmem:[%s601_s4 + $0x10] sm:$0xff]  ;;  %v225_v47 = vld [vmem:[%s601_s4 + $0x88] sm:$0xff]  ;;  %v224_v49 = vld [vmem:[%s601_s4 + $0x80] sm:$0xff] }
  0x16   :  { %347 = vmatprep.subr.mxu0 %v233_v31  ;;  %v209_v48 = vld [vmem:[%s601_s4 + $0x8] sm:$0xff]  ;;  %v208_v50 = vld [vmem:[%s601_s4] sm:$0xff] }
  0x17   :  { %348 = vmatpush3.msra.mxu0 %v217_v32  ;;  %v24_v55 = vld [vmem:[%s602_s5] sm:$0x3]  ;;  %v334_v5 = vld [vmem:[%s602_s5 + $0x2] ss:$0 sm:$0xff] }
  0x18   :  { %349 = vmatprep.subr.mxu0 %v232_v33  ;;  %v197_v59 = vrot.slane %v24_v55, %v196_v54  ;;  %v201_v61 = vrot.slane %v24_v55, %v200_v56 }
  0x19   :  { %350 = vmatpush3.msra.mxu0 %v216_v34 }
  0x1a   :  { %351 = vmatprep.subr.mxu0 %v231_v35 }
  0x1b   :  { %352 = vmatpush3.msra.mxu0 %v215_v36 }
  0x1c   :  { %353 = vmatprep.subr.mxu0 %v230_v37 }
  0x1d   :  { %354 = vmatpush3.msra.mxu0 %v214_v38 }
  0x1e   :  { %355 = vmatprep.subr.mxu0 %v229_v39 }
  0x1f   :  { %356 = vmatpush3.msra.mxu0 %v213_v40 }
  0x20   :  { %357 = vmatprep.subr.mxu0 %v228_v41 }
  0x21   :  { %358 = vmatpush3.msra.mxu0 %v212_v42 }
  0x22   :  { %359 = vmatprep.subr.mxu0 %v227_v43 }
  0x23   :  { %360 = vmatpush3.msra.mxu0 %v211_v44 }
  0x24   :  { %361 = vmatprep.subr.mxu0 %v226_v45 }
  0x25   :  { %362 = vmatpush3.msra.mxu0 %v210_v46 }
  0x26   :  { %363 = vmatprep.subr.mxu0 %v225_v47 }
  0x27   :  { %364 = vmatpush3.msra.mxu0 %v209_v48 }
  0x28   :  { %365 = vmatprep.subr.mxu0 %v224_v49 }
  0x29   :  { %366 = vmatpush3.msra.mxu0 %v208_v50 }
  0xca   :  { %v114_v53 = vpop.f32.mrf.mxu1 }
  0xcc   :  { %v116_v57 = vpop.f32.mrf.mxu1 }
  0xd2   :  { %v188_v58 = vpop.f32.mrf.mxu1 }
  0xd3   :  { %v189_v60 = vadd.f32 %v188_v58, %v114_v53 }
  0xd4   :  { %v190_v62 = vpop.f32.mrf.mxu1 }
  0xd5   :  { %v191_v63 = vadd.f32 %v190_v62, %v116_v57  ;;  %v204_v0 = vadd.f32 %v197_v59, %v189_v60 }
  0xd7   :  { %v205_v1 = vadd.f32 %v201_v61, %v191_v63  ;;  %v206_v3 = vmax.f32 %v204_v0, 0.0 }
  0xd9   :  { %v207_v2 = vmax.f32 %v205_v1, 0.0 }
  0xdb   :  { %310 = vmatprep.mubr.f32.mxu0 %v207_v2 }
  0xdc   :  { %311 = vmatmul.mubr.f32.vlgmr.msra.gmra.mxu0 %v206_v3 }
 0x19c   :  { %v367_v4 = vpop.f32.mrf.mxu0 }
 0x19e   :  { %v368_v6 = vpop.f32.mrf.mxu0 }
 0x19f   :  { %v369_v7 = vadd.f32 %v368_v6, %v367_v4 }
 0x1a1   :  { %v313_v8 = vadd.f32 %v369_v7, %v334_v5 }
 0x1a3   :  { %v316_v9 = vadd.f32 %v313_v8, %v510_v26 }
 0x1a5   :  { %317 = vst.msk [vmem:[#allocation2] sm:$0xff] %vm44_vm0, %v316_v9 }
 0x1a6   :  { %383 = shalt.err (!%p380_p4)
}
 0x1a7   :  { %327 = dma.vmem_to_hbm [thread:$0]  %s325_s19, 128, %s603_s6, [#allocation3]  }
 0x1a8   :  { %392 = dma.done.wait [#allocation3], 128  }
 0x1a9   :  { %393 = vsyncadd [#allocation3], 4294967168 }
 0x1aa   :  { %331 = vsyncpa [#allocation3], 1 }

</bundles_post_ra>
